<compile_context>
chip_gen: v7x
topology: tpu7x:2x2x1
jax: 0.10.0
libtpu: 0.0.40
codegen_flags: <defaults>
</compile_context>

<pallas_src>
import jax
import jax.numpy as jnp
from jax.experimental import pallas as pl
from jax.experimental.pallas import tpu as pltpu


def _round_up(n, m):
    return ((n + m - 1) // m) * m


def _default_num_cores():
    """Best-effort TensorCore count of the first device (2 on megacore parts)."""
    try:
        return max(1, int(getattr(jax.devices()[0], "num_cores", 1)))
    except Exception:
        return 1


def actor_mlp_kernel(xt_ref, w1t_ref, b1_ref, w2t_ref, b2_ref, w3t_ref, b3_ref,
                     ot_ref):
    """One feature-major batch tile of the 3-layer MLP.

    xt_ref:  [in, tile_b]      f32, batch on the 128-lane axis
    w1t_ref: [hidden, in]      b1_ref: [hidden, 1]
    w2t_ref: [hidden, hidden]  b2_ref: [hidden, 1]
    w3t_ref: [out, hidden]     b3_ref: [out, 1]
    ot_ref:  [out, tile_b]     lane-dense output tile
    """
    xt = xt_ref[...]
    # Layer 1: MXU matmul (f32 accumulate) + lane-broadcast bias + tanh (EUP).
    h1 = jnp.tanh(
        jnp.dot(w1t_ref[...], xt, preferred_element_type=jnp.float32)
        + b1_ref[...])
    # Layer 2.
    h2 = jnp.tanh(
        jnp.dot(w2t_ref[...], h1, preferred_element_type=jnp.float32)
        + b2_ref[...])
    # Head: one MXU dot writes the lane-dense [out, tile_b] tile directly.
    ot_ref[...] = (
        jnp.dot(w3t_ref[...], h2, preferred_element_type=jnp.float32)
        + b3_ref[...]).astype(ot_ref.dtype)


def actor_network(x, params, *, block_b=2048, num_cores=None):
    """x: [B, input_size] f32. params: dict with w1,b1,w2,b2,w3,b3 (+ log_std).

    Weights are stored as [in_features, out_features] (transposed vs. PyTorch's
    nn.Linear weight [out, in]); biases as [1, out_features].
    Returns [B, output_size] f32 (same math as Actor_network.forward).
    """
    B, in_size = x.shape
    hidden = params["w1"].shape[1]
    out_size = params["w3"].shape[1]

    if num_cores is None:
        num_cores = _default_num_cores()

    # Pad the batch only to a multiple of 128 lanes, then split into at most
    # one tile per TensorCore (extra serial steps buy nothing on 1-TC parts),
    # keeping each tile under `block_b` rows for VMEM.
    b_pad128 = _round_up(B, 128)
    n_tiles = max(num_cores, pl.cdiv(b_pad128, block_b))
    n_tiles = max(1, min(n_tiles, b_pad128 // 128))   # >= 128 rows per tile
    tile_b = _round_up(pl.cdiv(b_pad128, n_tiles), 128)
    b_pad = tile_b * n_tiles

    # Feature-major: batch on the lane axis everywhere.
    xt = x.T
    if b_pad != B:
        xt = jnp.pad(xt, ((0, 0), (0, b_pad - B)))

    # Weights transposed so every matmul is [feat_out, feat_in] @ [feat_in, b];
    # biases as [feat_out, 1] columns (lane-broadcast inside the kernel).
    w1t, b1 = params["w1"].T, params["b1"].reshape(hidden, 1)
    w2t, b2 = params["w2"].T, params["b2"].reshape(hidden, 1)
    w3t, b3 = params["w3"].T, params["b3"].reshape(out_size, 1)

    # Weights/biases: full-array blocks with constant index_maps -> VMEM
    # resident across all grid steps (DMA'd once).
    full = lambda a: pl.BlockSpec(a.shape, lambda i: (0,) * a.ndim)

    # Explicit VMEM budget sized from the actual buffers (double-buffered I/O
    # tiles + weights + f32 activations + slack), so large hidden sizes do not
    # silently hit the default scoped-VMEM limit. Capped below v7x's 64 MiB.
    w_bytes = 4 * (in_size * hidden + hidden + hidden * hidden + hidden
                   + hidden * out_size + out_size)
    io_bytes = 4 * tile_b * (in_size + out_size)
    act_bytes = 4 * tile_b * 2 * hidden
    vmem_limit = int(min(max(2 * (w_bytes + io_bytes) + act_bytes + (4 << 20),
                             8 << 20),
                         48 << 20))

    flops = b_pad * 2 * (in_size * hidden + hidden * hidden
                         + hidden * out_size)
    bytes_accessed = 4 * b_pad * (in_size + out_size) + w_bytes

    out_t = pl.pallas_call(
        actor_mlp_kernel,
        out_shape=jax.ShapeDtypeStruct((out_size, b_pad), jnp.float32),
        grid=(n_tiles,),
        in_specs=[
            pl.BlockSpec((in_size, tile_b), lambda i: (0, i)),   # x batch tile
            full(w1t), full(b1), full(w2t), full(b2),
            full(w3t), full(b3),
        ],
        out_specs=pl.BlockSpec((out_size, tile_b), lambda i: (0, i)),
        compiler_params=pltpu.CompilerParams(
            dimension_semantics=("parallel",),
            vmem_limit_bytes=vmem_limit),
        cost_estimate=pl.CostEstimate(
            flops=flops,
            transcendentals=2 * b_pad * hidden,
            bytes_accessed=bytes_accessed),
    )(xt, w1t, b1, w2t, b2, w3t, b3)

    # Slice off batch padding first (fewer columns to move), then back to the
    # PyTorch [B, out_size] layout.
    return out_t[:, :B].T


def init_params(key, input_size, hidden_size, output_size=2):
    """Deterministic init mimicking nn.Linear's U(-1/sqrt(fan_in), 1/sqrt(fan_in))."""
    ks = jax.random.split(key, 6)

    def linear(kw, kb, fan_in, fan_out):
        bound = 1.0 / jnp.sqrt(jnp.float32(fan_in))
        w = jax.random.uniform(kw, (fan_in, fan_out), jnp.float32, -bound, bound)
        b = jax.random.uniform(kb, (1, fan_out), jnp.float32, -bound, bound)
        return w, b

    w1, b1 = linear(ks[0], ks[1], input_size, hidden_size)
    w2, b2 = linear(ks[2], ks[3], hidden_size, hidden_size)
    w3, b3 = linear(ks[4], ks[5], hidden_size, output_size)
    return {"w1": w1, "b1": b1, "w2": w2, "b2": b2, "w3": w3, "b3": b3,
            # log_std parameter exists on the PyTorch module but is not used
            # in forward(); kept here only for parameter-set fidelity.
            "log_std": jnp.zeros((1,), jnp.float32)}


if __name__ == "__main__":
    key = jax.random.PRNGKey(0)
    k_x, k_p = jax.random.split(key)

    # Non-128-multiple batch exercises the (minimal) padding path.
    batch, input_size, hidden_size, output_size = 600, 16, 32, 2
    x = jax.random.normal(k_x, (batch, input_size), jnp.float32)
    params = init_params(k_p, input_size, hidden_size, output_size)

    out = actor_network(x, params)
    out = jax.block_until_ready(out)

    # Pure-JAX reference (same math as Actor_network.forward).
    h = jnp.tanh(x @ params["w1"] + params["b1"])
    h = jnp.tanh(h @ params["w2"] + params["b2"])
    ref = h @ params["w3"] + params["b3"]

    assert out.shape == (batch, output_size), out.shape
    assert jnp.allclose(out, ref, atol=1e-5, rtol=1e-5), float(
        jnp.max(jnp.abs(out - ref)))

    print("KERNEL_OK")
</pallas_src>

<mosaic_0001>
module attributes {stable_mosaic.version = 11 : i64} {
  func.func @actor_mlp_kernel(%arg0: i32, %arg1: memref<16x640xf32, #tpu.memory_space<vmem>>, %arg2: memref<32x16xf32, #tpu.memory_space<vmem>>, %arg3: memref<32x1xf32, #tpu.memory_space<vmem>>, %arg4: memref<32x32xf32, #tpu.memory_space<vmem>>, %arg5: memref<32x1xf32, #tpu.memory_space<vmem>>, %arg6: memref<2x32xf32, #tpu.memory_space<vmem>>, %arg7: memref<2x1xf32, #tpu.memory_space<vmem>>, %arg8: memref<2x640xf32, #tpu.memory_space<vmem>>) attributes {dimension_semantics = [#tpu.dimension_semantics<parallel>], iteration_bounds = array<i64: 1>, scalar_prefetch = 0 : i64, scratch_operands = 0 : i64, tpu.core_type = #tpu.core_type<tc>, window_params = [{transform_indices = @transform_0, window_bounds = array<i64: 16, 640>}, {pipeline_mode = #tpu.pipeline_mode<synchronous>, transform_indices = @transform_1, window_bounds = array<i64: 32, 16>}, {pipeline_mode = #tpu.pipeline_mode<synchronous>, transform_indices = @transform_2, window_bounds = array<i64: 32, 1>}, {pipeline_mode = #tpu.pipeline_mode<synchronous>, transform_indices = @transform_3, window_bounds = array<i64: 32, 32>}, {pipeline_mode = #tpu.pipeline_mode<synchronous>, transform_indices = @transform_4, window_bounds = array<i64: 32, 1>}, {pipeline_mode = #tpu.pipeline_mode<synchronous>, transform_indices = @transform_5, window_bounds = array<i64: 2, 32>}, {pipeline_mode = #tpu.pipeline_mode<synchronous>, transform_indices = @transform_6, window_bounds = array<i64: 2, 1>}, {transform_indices = @transform_7, window_bounds = array<i64: 2, 640>}]} {
    %c0 = arith.constant 0 : index
    %c0_0 = arith.constant 0 : index
    %0 = vector.load %arg1[%c0, %c0_0] : memref<16x640xf32, #tpu.memory_space<vmem>>, vector<16x640xf32>
    %c0_1 = arith.constant 0 : index
    %c0_2 = arith.constant 0 : index
    %1 = vector.load %arg2[%c0_1, %c0_2] : memref<32x16xf32, #tpu.memory_space<vmem>>, vector<32x16xf32>
    %cst = arith.constant dense<0.000000e+00> : vector<32x640xf32>
    %2 = tpu.matmul %1, %0, %cst {dimension_numbers = #tpu.dot_dimension_numbers<[1], [0], [0], [1], [0, 0, 1, 1], [], []>} : vector<32x16xf32>, vector<16x640xf32>, vector<32x640xf32> -> vector<32x640xf32>
    %c0_3 = arith.constant 0 : index
    %c0_4 = arith.constant 0 : index
    %3 = vector.load %arg3[%c0_3, %c0_4] : memref<32x1xf32, #tpu.memory_space<vmem>>, vector<32x1xf32>
    %4 = vector.broadcast %3 : vector<32x1xf32> to vector<32x640xf32>
    %5 = arith.addf %2, %4 : vector<32x640xf32>
    %6 = math.tanh %5 : vector<32x640xf32>
    %c0_5 = arith.constant 0 : index
    %c0_6 = arith.constant 0 : index
    %7 = vector.load %arg4[%c0_5, %c0_6] : memref<32x32xf32, #tpu.memory_space<vmem>>, vector<32x32xf32>
    %cst_7 = arith.constant dense<0.000000e+00> : vector<32x640xf32>
    %8 = tpu.matmul %7, %6, %cst_7 {dimension_numbers = #tpu.dot_dimension_numbers<[1], [0], [0], [1], [0, 0, 1, 1], [], []>} : vector<32x32xf32>, vector<32x640xf32>, vector<32x640xf32> -> vector<32x640xf32>
    %c0_8 = arith.constant 0 : index
    %c0_9 = arith.constant 0 : index
    %9 = vector.load %arg5[%c0_8, %c0_9] : memref<32x1xf32, #tpu.memory_space<vmem>>, vector<32x1xf32>
    %10 = vector.broadcast %9 : vector<32x1xf32> to vector<32x640xf32>
    %11 = arith.addf %8, %10 : vector<32x640xf32>
    %12 = math.tanh %11 : vector<32x640xf32>
    %c0_10 = arith.constant 0 : index
    %c0_11 = arith.constant 0 : index
    %13 = vector.load %arg6[%c0_10, %c0_11] : memref<2x32xf32, #tpu.memory_space<vmem>>, vector<2x32xf32>
    %cst_12 = arith.constant dense<0.000000e+00> : vector<2x640xf32>
    %14 = tpu.matmul %13, %12, %cst_12 {dimension_numbers = #tpu.dot_dimension_numbers<[1], [0], [0], [1], [0, 0, 1, 1], [], []>} : vector<2x32xf32>, vector<32x640xf32>, vector<2x640xf32> -> vector<2x640xf32>
    %c0_13 = arith.constant 0 : index
    %c0_14 = arith.constant 0 : index
    %15 = vector.load %arg7[%c0_13, %c0_14] : memref<2x1xf32, #tpu.memory_space<vmem>>, vector<2x1xf32>
    %16 = vector.broadcast %15 : vector<2x1xf32> to vector<2x640xf32>
    %17 = arith.addf %14, %16 : vector<2x640xf32>
    %c0_15 = arith.constant 0 : index
    %c0_16 = arith.constant 0 : index
    %18 = vector.load %arg8[%c0_15, %c0_16] : memref<2x640xf32, #tpu.memory_space<vmem>>, vector<2x640xf32>
    tpu.vector_store %arg8[%c0_15, %c0_16], %17 {strides = array<i32>} : memref<2x640xf32, #tpu.memory_space<vmem>>, vector<2x640xf32>,
    return
  }
  func.func @transform_0(%arg0: i32) -> (i32, i32) {
    %c0_i32 = arith.constant 0 : i32
    %c0_i32_0 = arith.constant 0 : i32
    return %c0_i32, %arg0 : i32, i32
  }
  func.func @transform_1(%arg0: i32) -> (i32, i32) {
    %c0_i32 = arith.constant 0 : i32
    %c0_i32_0 = arith.constant 0 : i32
    %c0_i32_1 = arith.constant 0 : i32
    return %c0_i32, %c0_i32_0 : i32, i32
  }
  func.func @transform_2(%arg0: i32) -> (i32, i32) {
    %c0_i32 = arith.constant 0 : i32
    %c0_i32_0 = arith.constant 0 : i32
    %c0_i32_1 = arith.constant 0 : i32
    return %c0_i32, %c0_i32_0 : i32, i32
  }
  func.func @transform_3(%arg0: i32) -> (i32, i32) {
    %c0_i32 = arith.constant 0 : i32
    %c0_i32_0 = arith.constant 0 : i32
    %c0_i32_1 = arith.constant 0 : i32
    return %c0_i32, %c0_i32_0 : i32, i32
  }
  func.func @transform_4(%arg0: i32) -> (i32, i32) {
    %c0_i32 = arith.constant 0 : i32
    %c0_i32_0 = arith.constant 0 : i32
    %c0_i32_1 = arith.constant 0 : i32
    return %c0_i32, %c0_i32_0 : i32, i32
  }
  func.func @transform_5(%arg0: i32) -> (i32, i32) {
    %c0_i32 = arith.constant 0 : i32
    %c0_i32_0 = arith.constant 0 : i32
    %c0_i32_1 = arith.constant 0 : i32
    return %c0_i32, %c0_i32_0 : i32, i32
  }
  func.func @transform_6(%arg0: i32) -> (i32, i32) {
    %c0_i32 = arith.constant 0 : i32
    %c0_i32_0 = arith.constant 0 : i32
    %c0_i32_1 = arith.constant 0 : i32
    return %c0_i32, %c0_i32_0 : i32, i32
  }
  func.func @transform_7(%arg0: i32) -> (i32, i32) {
    %c0_i32 = arith.constant 0 : i32
    %c0_i32_0 = arith.constant 0 : i32
    return %c0_i32, %arg0 : i32, i32
  }
}

</mosaic_0001>

<bundles_post_ra>
// kernel: tpu_custom_call.1
= control target key start
LH: loop header
LB: loop body
LE: loop exit
PB: predicated region body
PF: predicated region fallthrough
CT: control target
= control target key end

     0   :  { %v1208_v5 = vmov 0.0   ;;  %v1209_v10 = vmov 0   ;;  %vm65_vm0 = vcmask 130048   ;;  %s1403_s0 = inlined_call_operand.vmem [shape: f32[16,640], index: 0, kind: input, shape index: {}]   ;;  %s1404_s1 = inlined_call_operand.vmem [shape: f32[32,16], index: 1, kind: input, shape index: {}]   ;;  %s1405_s2 = inlined_call_operand.vmem [shape: f32[32,1], index: 2, kind: input, shape index: {}]   ;;  %s1406_s3 = inlined_call_operand.vmem [shape: f32[32,32], index: 3, kind: input, shape index: {}]   ;;  %s1407_s4 = inlined_call_operand.vmem [shape: f32[32,1], index: 4, kind: input, shape index: {}]   ;;  %s1408_s5 = inlined_call_operand.vmem [shape: f32[2,32], index: 5, kind: input, shape index: {}]   ;;  %s1409_s6 = inlined_call_operand.vmem [shape: f32[2,1], index: 6, kind: input, shape index: {}]   ;;  %s1410_s7 = inlined_call_operand.hbm [shape: f32[2,640], index: 7, kind: output, shape index: {}]  }
   0x1   :  { %v28_v0 = vld [vmem:[%s1403_s0 + $0x8] sm:$0xff]  ;;  %v33_v1 = vld [vmem:[%s1403_s0 + $0x30] sm:$0xff]  ;;  %v27_v2 = vld [vmem:[%s1403_s0] sm:$0xff]  ;;  %142 = vmatprep.mubr.f32.mxu0 %v1208_v5  ;;  %160 = vmatprep.mubr.f32.mxu1 %v1208_v5 }
   0x2   :  { %v1036_v3 = vpack.c.bf16 %v33_v1, %v28_v0  ;;  %v32_v4 = vld [vmem:[%s1403_s0 + $0x28] sm:$0xff]  ;;  %v30_v7 = vld [vmem:[%s1403_s0 + $0x18] sm:$0xff]  ;;  %v35_v8 = vld [vmem:[%s1403_s0 + $0x40] sm:$0xff]  ;;  %1102 = vset.pattern.permute.xlu0 %v1209_v10  ;;  %1103 = vset.pattern.permute.xlu1 %v1209_v10 }
   0x3   :  { %v1038_v6 = vpack.c.bf16 %v32_v4, %v27_v2  ;;  %v29_v9 = vld [vmem:[%s1403_s0 + $0x10] sm:$0xff]  ;;  %v37_v11 = vld [vmem:[%s1404_s1] sm:$0xff]  ;;  %v40_v12 = vld [vmem:[%s1404_s1 + $0x18] sm:$0xff]  ;;  %v1040_v13 = vpack.c.bf16 %v35_v8, %v30_v7 }
   0x4   :  { %1037 = vmatprep.subr.bf16.mxu0 %v1036_v3  ;;  %1094 = vmatprep.subr.bf16.mxu1 %v1036_v3  ;;  %v34_v14 = vld [vmem:[%s1403_s0 + $0x38] sm:$0xff]  ;;  %v31_v16 = vld [vmem:[%s1403_s0 + $0x20] sm:$0xff]  ;;  %v36_v17 = vld [vmem:[%s1403_s0 + $0x48] sm:$0xff] }
   0x5   :  { %1039 = vmatpush1.bf16.msra.mxu0 %v1038_v6  ;;  %1095 = vmatpush1.bf16.msra.mxu1 %v1038_v6  ;;  %v1042_v15 = vpack.c.bf16 %v34_v14, %v29_v9  ;;  %v41_v18 = vld [vmem:[%s1405_s2] sm:$0xff]  ;;  %v1044_v19 = vpack.c.bf16 %v36_v17, %v31_v16  ;;  %v43_v20 = vld [vmem:[%s1405_s2 + $0x10] sm:$0xff]  ;;  %v42_v21 = vld [vmem:[%s1405_s2 + $0x8] sm:$0xff] }
   0x6   :  { %1041 = vmatprep.subr.bf16.mxu1 %v1040_v13  ;;  %47 = vperm.xlu0 %1102, %v41_v18  }
   0x7   :  { %57 = vperm.xlu1 %1103, %v43_v20  }
   0x8   :  { %954 = vmatmul.mubr.msk.f32.vlgmr.msra.gmra.mrb[0].mxu0 %vm65_vm0, %v37_v11  ;;  %957 = vmatmul.mubr.msk.f32.vlgmr.msra.gmra.mrb[0].mxu1 %vm65_vm0, %v40_v12 }
   0x9   :  { %12 = vsyncpa [#allocation3], 0  ;;  %1043 = vmatpush1.bf16.msra.mxu1 %v1042_v15  ;;  %148 = vmatprep.mubr.f32.mxu0 %v1208_v5  ;;  %v38_v22 = vld [vmem:[%s1404_s1 + $0x8] sm:$0xff]  ;;  %v44_v23 = vld [vmem:[%s1405_s2 + $0x18] sm:$0xff]  ;;  %vm389_vm1 = vcmask 261120   ;;  %vm1211_vm2 = vmmov 0  }
   0xa   :  { %231 = vmatprep.mubr.f32.mxu1 %v1208_v5  ;;  %1045 = vmatprep.subr.bf16.mxu0 %v1044_v19  ;;  %v365_v24 = vld [vmem:[%s1407_s4] sm:$0xff]  ;;  %v39_v25 = vld [vmem:[%s1404_s1 + $0x10] sm:$0xff]  ;;  %v366_v26 = vld [vmem:[%s1407_s4 + $0x8] sm:$0xff] }
   0xb   :  { %1047 = vmatpush3.bf16.msra.mxu0 %v1044_v19  ;;  %52 = vperm.xlu0 %1102, %v42_v21   ;;  %v367_v27 = vld [vmem:[%s1407_s4 + $0x10] sm:$0xff]  ;;  %v368_v28 = vld [vmem:[%s1407_s4 + $0x18] sm:$0xff]  ;;  %v686_v29 = vld [vmem:[%s1409_s6] sm:$0x3] }
   0xc   :  { %955 = vmatmul.mubr.msk.f32.gmra.mrb[2].mxu0 %vm65_vm0, %v38_v22  ;;  %958 = vmatmul.mubr.msk.f32.vlgmr.msra.gmra.mrb[2].mxu1 %vm65_vm0, %v37_v11 }
   0xd   :  { %154 = vmatprep.mubr.f32.mxu0 %v1208_v5  ;;  %237 = vmatprep.mubr.f32.mxu1 %v1208_v5 }
   0xe   :  { %62 = vperm.xlu1 %1103, %v44_v23  }
   0xf   :  { %371 = vperm.xlu0 %1102, %v365_v24  }
  0x10   :  { %956 = vmatmul.mubr.msk.f32.gmra.mrb[4].mxu0 %vm65_vm0, %v39_v25  ;;  %959 = vmatmul.mubr.msk.f32.gmra.mrb[4].mxu1 %vm65_vm0, %v38_v22 }
  0x11   :  { %243 = vmatprep.mubr.f32.mxu1 %v1208_v5  ;;  %1005 = vmatprep.mubr.msk.f32.mxu0 %vm65_vm0, %v37_v11 }
  0x12   :  { %376 = vperm.xlu1 %1103, %v366_v26  }
  0x13   :  { %381 = vperm.xlu0 %1102, %v367_v27  }
  0x14   :  { %960 = vmatmul.mubr.msk.f32.gmra.mrb[6].mxu1 %vm65_vm0, %v39_v25  ;;  %1006 = vmatmul.mubr.msk.f32.vlgmr.msra.gmra.mrb[6].mxu0 %vm65_vm0, %v38_v22 }
  0x15   :  { %249 = vmatprep.mubr.f32.mxu1 %v1208_v5  ;;  %1008 = vmatprep.mubr.msk.f32.mxu0 %vm65_vm0, %v39_v25 }
  0x16   :  { %386 = vperm.xlu1 %1103, %v368_v28  }
  0x17   :  { %689 = vperm.xlu0 %1102, %v686_v29  }
  0x18   :  { %961 = vmatmul.mubr.msk.f32.gmra.mrb[8].mxu1 %vm65_vm0, %v40_v12  ;;  %1009 = vmatmul.mubr.msk.f32.gmra.mrb[8].mxu0 %vm65_vm0, %v40_v12 }
  0x19   :  { %466 = vmatprep.mubr.f32.mxu1 %v1208_v5  ;;  %555 = vmatprep.mubr.f32.mxu0 %v1208_v5 }
  0x85   :  { %v48_v31 = vpop.permute.xlu0 %47 }
  0x86   :  { %v1345_v30 = vpop.permute.xlu1 %57 }
  0x8a   :  { %v53_v41 = vpop.permute.xlu0 %52 }
  0x8d   :  { %v63_v32 = vpop.permute.xlu1 %62 }
  0xdb   :  { %v144_v33 = vpop.f32.mrb[0].mxu0  ;;  %v162_v34 = vpop.f32.mrb[0].mxu1 }
  0xdc   :  { %v145_v35 = vadd.f32 %v144_v33, %v48_v31  ;;  %v163_v36 = vadd.f32 %v162_v34, %v63_v32  ;;  %v146_v37 = vpop.f32.mrb[1].mxu0  ;;  %v164_v38 = vpop.f32.mrb[1].mxu1 }
  0xdd   :  { %v147_v39 = vadd.f32 %v146_v37, %v48_v31  ;;  %v165_v40 = vadd.f32 %v164_v38, %v63_v32 }
  0xde   :  { %1104 = vtanh.f32 %v145_v35 }
  0xdf   :  { %1106 = vtanh.f32 %v163_v36  ;;  %v150_v42 = vpop.f32.mrb[2].mxu0  ;;  %v233_v43 = vpop.f32.mrb[2].mxu1 }
  0xe0   :  { %1108 = vtanh.f32 %v147_v39  ;;  %v151_v44 = vadd.f32 %v150_v42, %v53_v41  ;;  %v234_v45 = vadd.f32 %v233_v43, %v48_v31  ;;  %v152_v46 = vpop.f32.mrb[3].mxu0  ;;  %v235_v47 = vpop.f32.mrb[3].mxu1  ;;  %v362_v39 = vld [vmem:[%s1406_s3 + $0x8] sm:$0xff]  ;;  %v363_v43 = vld [vmem:[%s1406_s3 + $0x10] sm:$0xff] }
  0xe1   :  { %1110 = vtanh.f32 %v165_v40  ;;  %v153_v48 = vadd.f32 %v152_v46, %v53_v41  ;;  %v236_v49 = vadd.f32 %v235_v47, %v48_v31 }
  0xe2   :  { %1112 = vtanh.f32 %v151_v44  ;;  %v364_v44 = vld [vmem:[%s1406_s3 + $0x18] sm:$0xff] }
  0xe3   :  { %1114 = vtanh.f32 %v234_v45  ;;  %v156_v50 = vpop.f32.mrb[4].mxu0  ;;  %v239_v51 = vpop.f32.mrb[4].mxu1 }
  0xe4   :  { %1116 = vtanh.f32 %v153_v48  ;;  %v157_v52 = vadd.f32 %v156_v50, %v1345_v30  ;;  %v240_v53 = vadd.f32 %v239_v51, %v53_v41  ;;  %v158_v54 = vpop.f32.mrb[5].mxu0  ;;  %v241_v55 = vpop.f32.mrb[5].mxu1 }
  0xe5   :  { %1118 = vtanh.f32 %v236_v49  ;;  %v159_v56 = vadd.f32 %v158_v54, %v1345_v30  ;;  %v242_v57 = vadd.f32 %v241_v55, %v53_v41  ;;  %v372_v45 = vpop.permute.xlu0 %371  ;;  %v377_v50 = vpop.permute.xlu1 %376 }
  0xe6   :  { %1120 = vtanh.f32 %v157_v52 }
  0xe7   :  { %1122 = vtanh.f32 %v240_v53  ;;  %v245_v58 = vpop.f32.mrb[6].mxu1  ;;  %v1007_v59 = vpop.f32.mrb[6].mxu0 }
  0xe8   :  { %v1105_v60 = vpop.eup %1104  ;;  %1124 = vtanh.f32 %v159_v56  ;;  %v246_v61 = vadd.f32 %v245_v58, %v1345_v30  ;;  %v328_v62 = vadd.f32 %v1007_v59, %v53_v41  ;;  %v247_v63 = vpop.f32.mrb[7].mxu1 }
  0xe9   :  { %v322_v0 = vpop.f32.mrb[7].mxu0  ;;  %v1107_v1 = vpop.eup %1106  ;;  %1126 = vtanh.f32 %v242_v57  ;;  %v248_v2 = vadd.f32 %v247_v63, %v1345_v30 }
  0xea   :  { %v323_v3 = vadd.f32 %v322_v0, %v48_v31  ;;  %v1109_v4 = vpop.eup %1108  ;;  %1128 = vtanh.f32 %v246_v61  ;;  %v382_v55 = vpop.permute.xlu0 %381 }
  0xeb   :  { %v1111_v6 = vpop.eup %1110  ;;  %1130 = vtanh.f32 %v328_v62  ;;  %v251_v7 = vpop.f32.mrb[8].mxu1 }
  0xec   :  { %v1010_v8 = vpop.f32.mrb[8].mxu0  ;;  %v1113_v9 = vpop.eup %1112  ;;  %1132 = vtanh.f32 %v248_v2  ;;  %v252_v10 = vadd.f32 %v251_v7, %v63_v32 }
  0xed   :  { %v338_v11 = vadd.f32 %v1010_v8, %v63_v32  ;;  %v253_v12 = vpop.f32.mrb[9].mxu1  ;;  %v332_v13 = vpop.f32.mrb[9].mxu0  ;;  %1134 = vtanh.f32 %v323_v3  ;;  %v1050_v17 = vpack.c.bf16 %v1113_v9, %v1105_v60 }
  0xee   :  { %v1115_v14 = vpop.eup %1114  ;;  %v254_v15 = vadd.f32 %v253_v12, %v63_v32  ;;  %v333_v16 = vadd.f32 %v332_v13, %v1345_v30  ;;  %1136 = vtanh.f32 %v252_v10  ;;  %v361_v32 = vld [vmem:[%s1406_s3] sm:$0xff]  ;;  %v387_v0 = vpop.permute.xlu1 %386 }
  0xef   :  { %v1117_v18 = vpop.eup %1116  ;;  %1138 = vtanh.f32 %v338_v11 }
  0xf0   :  { %v1119_v19 = vpop.eup %1118  ;;  %v1048_v20 = vpack.c.bf16 %v1117_v18, %v1109_v4  ;;  %1140 = vtanh.f32 %v254_v15 }
  0xf1   :  { %v1121_v21 = vpop.eup %1120  ;;  %1142 = vtanh.f32 %v333_v16 }
  0xf2   :  { %v1123_v22 = vpop.eup %1122  ;;  %1049 = vmatprep.subr.bf16.mxu1 %v1048_v20  ;;  %v1054_v23 = vpack.c.bf16 %v1107_v1, %v1121_v21 }
  0xf3   :  { %v1125_v24 = vpop.eup %1124  ;;  %1051 = vmatpush1.bf16.msra.mxu1 %v1050_v17  ;;  %v1058_v25 = vpack.c.bf16 %v1123_v22, %v1115_v14 }
  0xf4   :  { %v1127_v26 = vpop.eup %1126  ;;  %v1052_v27 = vpack.c.bf16 %v1111_v6, %v1125_v24 }
  0xf5   :  { %v1129_v28 = vpop.eup %1128  ;;  %v1056_v29 = vpack.c.bf16 %v1127_v26, %v1119_v19 }
  0xf6   :  { %v1131_v30 = vpop.eup %1130  ;;  %1053 = vmatprep.subr.bf16.mxu1 %v1052_v27 }
  0xf7   :  { %v1133_v31 = vpop.eup %1132  ;;  %1057 = vmatprep.subr.bf16.mxu0 %v1056_v29  ;;  %1055 = vmatpush1.bf16.msra.mxu1 %v1054_v23 }
  0xf8   :  { %v1135_v33 = vpop.eup %1134  ;;  %1059 = vmatpush1.bf16.msra.mxu0 %v1058_v25 }
  0xf9   :  { %v1137_v34 = vpop.eup %1136  ;;  %v1064_v35 = vpack.c.bf16 %v1131_v30, %v1135_v33 }
  0xfa   :  { %v1139_v36 = vpop.eup %1138  ;;  %966 = vmatmul.mubr.msk.f32.vlgmr.msra.gmra.mrb[10].mxu1 %vm389_vm1, %v361_v32  ;;  %v1062_v37 = vpack.c.bf16 %v1137_v34, %v1129_v28 }
  0xfb   :  { %v1141_v38 = vpop.eup %1140  ;;  %1065 = vmatprep.subr.bf16.mxu1 %v1064_v35  ;;  %472 = vmatprep.mubr.f32.mxu1 %v1208_v5 }
  0xfc   :  { %v1143_v40 = vpop.eup %1142  ;;  %1067 = vmatpush3.bf16.msra.mxu1 %v1064_v35  ;;  %v1060_v41 = vpack.c.bf16 %v1141_v38, %v1133_v31 }
  0xfd   :  { %v1068_v42 = vpack.c.bf16 %v1139_v36, %v1143_v40 }
  0xfe   :  { %967 = vmatmul.mubr.msk.f32.gmra.mrb[12].mxu1 %vm389_vm1, %v362_v39  ;;  %1061 = vmatprep.subr.bf16.mxu0 %v1060_v41 }
  0xff   :  { %1069 = vmatprep.subr.bf16.mxu1 %v1068_v42  ;;  %1063 = vmatpush1.bf16.msra.mxu0 %v1062_v37 }
 0x100   :  { %1071 = vmatpush3.bf16.msra.mxu1 %v1068_v42  ;;  %478 = vmatprep.mubr.f32.mxu1 %v1208_v5 }
 0x102   :  { %968 = vmatmul.mubr.msk.f32.gmra.mrb[14].mxu1 %vm389_vm1, %v363_v43  ;;  %970 = vmatmul.mubr.msk.f32.vlgmr.msra.gmra.mrb[10].mxu0 %vm389_vm1, %v361_v32 }
 0x103   :  { %484 = vmatprep.mubr.f32.mxu1 %v1208_v5  ;;  %561 = vmatprep.mubr.f32.mxu0 %v1208_v5 }
 0x106   :  { %969 = vmatmul.mubr.msk.f32.gmra.mrb[16].mxu1 %vm389_vm1, %v364_v44  ;;  %971 = vmatmul.mubr.msk.f32.gmra.mrb[12].mxu0 %vm389_vm1, %v362_v39 }
 0x107   :  { %567 = vmatprep.mubr.f32.mxu0 %v1208_v5  ;;  %1019 = vmatprep.mubr.msk.f32.mxu1 %vm389_vm1, %v361_v32 }
 0x10a   :  { %972 = vmatmul.mubr.msk.f32.gmra.mrb[14].mxu0 %vm389_vm1, %v363_v43  ;;  %1020 = vmatmul.mubr.msk.f32.vlgmr.msra.gmra.mrb[18].mxu1 %vm389_vm1, %v362_v39 }
 0x10b   :  { %573 = vmatprep.mubr.f32.mxu0 %v1208_v5  ;;  %1022 = vmatprep.mubr.msk.f32.mxu1 %vm389_vm1, %v363_v43 }
 0x10e   :  { %973 = vmatmul.mubr.msk.f32.gmra.mrb[16].mxu0 %vm389_vm1, %v364_v44  ;;  %1023 = vmatmul.mubr.msk.f32.gmra.mrb[20].mxu1 %vm389_vm1, %v364_v44 }
 0x10f   :  { %759 = vmatprep.mubr.f32.mxu0 %v1208_v5  ;;  %830 = vmatprep.mubr.f32.mxu1 %v1208_v5 }
 0x1cd   :  { %v468_v46 = vpop.f32.mrb[10].mxu1 }
 0x1ce   :  { %v469_v47 = vadd.f32 %v468_v46, %v372_v45  ;;  %v470_v48 = vpop.f32.mrb[11].mxu1 }
 0x1cf   :  { %v471_v49 = vadd.f32 %v470_v48, %v372_v45 }
 0x1d0   :  { %1144 = vtanh.f32 %v469_v47  ;;  %v685_v47 = vld [vmem:[%s1408_s5] sm:$0x3]  ;;  %s1213_s5 = smov [#allocation2]  }
 0x1d1   :  { %v474_v51 = vpop.f32.mrb[12].mxu1  ;;  %1146 = vtanh.f32 %v471_v49  ;;  %v1210_v49 = vmov 0.0|0.0   ;;  %s946_s28 = sshll.u32 %s1213_s5, 4  ;;  %s947_s28 = int_to_ptr.vmem [resolvable:$true] %s946_s28 }
 0x1d2   :  { %v475_v52 = vadd.f32 %v474_v51, %v377_v50  ;;  %v476_v53 = vpop.f32.mrb[13].mxu1  ;;  %s1184_s29 = scalar_lea.vmem %s947_s28, 160  ;;  %p1189_p1 = scmp.lt.s32.totalorder %s947_s28, %s947_s28 }
 0x1d3   :  { %v477_v54 = vadd.f32 %v476_v53, %v377_v50  ;;  %p1185_p0 = scmp.ne.s32.totalorder %s947_s28, %s1184_s29  ;;  %p1190_p2 = scmp.lt.s32.totalorder %s1184_s29, %s1184_s29 }
 0x1d4   :  { %1148 = vtanh.f32 %v475_v52 }
 0x1d5   :  { %1150 = vtanh.f32 %v477_v54  ;;  %v480_v56 = vpop.f32.mrb[14].mxu1  ;;  %v557_v57 = vpop.f32.mrb[10].mxu0  ;;  %p1191_p3 = por %p1190_p2, %p1189_p1 }
 0x1d6   :  { %v481_v58 = vadd.f32 %v480_v56, %v382_v55  ;;  %v558_v59 = vadd.f32 %v557_v57, %v372_v45  ;;  %v482_v60 = vpop.f32.mrb[15].mxu1  ;;  %v559_v61 = vpop.f32.mrb[11].mxu0 }
 0x1d7   :  { %v483_v62 = vadd.f32 %v482_v60, %v382_v55  ;;  %v560_v63 = vadd.f32 %v559_v61, %v372_v45  ;;  %p1192_p4 = pnand %p1191_p3, %p1185_p0 }
 0x1d8   :  { %1152 = vtanh.f32 %v481_v58  ;;  %v690_v58 = vpop.permute.xlu0 %689 }
 0x1d9   :  { %1154 = vtanh.f32 %v558_v59  ;;  %v486_v1 = vpop.f32.mrb[16].mxu1  ;;  %v563_v2 = vpop.f32.mrb[12].mxu0 }
 0x1da   :  { %1156 = vtanh.f32 %v483_v62  ;;  %v487_v3 = vadd.f32 %v486_v1, %v387_v0  ;;  %v564_v4 = vadd.f32 %v563_v2, %v377_v50  ;;  %v488_v6 = vpop.f32.mrb[17].mxu1  ;;  %v565_v7 = vpop.f32.mrb[13].mxu0  ;;  %v917_v1 = vlaneseq }
 0x1db   :  { %1158 = vtanh.f32 %v560_v63  ;;  %v489_v8 = vadd.f32 %v488_v6, %v387_v0  ;;  %v566_v9 = vadd.f32 %v565_v7, %v377_v50  ;;  %v1145_v10 = vpop.eup %1144  ;;  %v1212_v63 = vmov 1983009808  }
 0x1dc   :  { %1160 = vtanh.f32 %v487_v3  ;;  %v1147_v11 = vpop.eup %1146  ;;  %v918_v3 = vshrl.u32 %v917_v1, 7 }
 0x1dd   :  { %1162 = vtanh.f32 %v564_v4  ;;  %v569_v12 = vpop.f32.mrb[14].mxu0  ;;  %v1021_v13 = vpop.f32.mrb[18].mxu1 }
 0x1de   :  { %v1149_v14 = vpop.eup %1148  ;;  %1164 = vtanh.f32 %v489_v8  ;;  %v570_v15 = vadd.f32 %v569_v12, %v382_v55  ;;  %v652_v16 = vadd.f32 %v1021_v13, %v377_v50  ;;  %v571_v17 = vpop.f32.mrb[15].mxu0 }
 0x1df   :  { %v646_v18 = vpop.f32.mrb[19].mxu1  ;;  %v1151_v19 = vpop.eup %1150  ;;  %1166 = vtanh.f32 %v566_v9  ;;  %v572_v20 = vadd.f32 %v571_v17, %v382_v55  ;;  %v1074_v22 = vpack.c.bf16 %v1149_v14, %v1145_v10 }
 0x1e0   :  { %v647_v21 = vadd.f32 %v646_v18, %v372_v45  ;;  %1168 = vtanh.f32 %v570_v15  ;;  %v1072_v23 = vpack.c.bf16 %v1151_v19, %v1147_v11 }
 0x1e1   :  { %1170 = vtanh.f32 %v652_v16  ;;  %v575_v24 = vpop.f32.mrb[16].mxu0  ;;  %v1024_v25 = vpop.f32.mrb[20].mxu1 }
 0x1e2   :  { %v1153_v26 = vpop.eup %1152  ;;  %1172 = vtanh.f32 %v572_v20  ;;  %v576_v27 = vadd.f32 %v575_v24, %v387_v0  ;;  %v662_v28 = vadd.f32 %v1024_v25, %v387_v0  ;;  %v577_v29 = vpop.f32.mrb[17].mxu0  ;;  %1073 = vmatprep.subr.bf16.mxu0 %v1072_v23 }
 0x1e3   :  { %v656_v30 = vpop.f32.mrb[21].mxu1  ;;  %v1155_v31 = vpop.eup %1154  ;;  %1174 = vtanh.f32 %v647_v21  ;;  %v578_v32 = vadd.f32 %v577_v29, %v387_v0  ;;  %1075 = vmatpush1.bf16.msra.mxu0 %v1074_v22  ;;  %v915_v0 = vunpack.c.l.s4 %v1212_v63 }
 0x1e4   :  { %v657_v33 = vadd.f32 %v656_v30, %v382_v55  ;;  %v1157_v34 = vpop.eup %1156  ;;  %1176 = vtanh.f32 %v576_v27 }
 0x1e5   :  { %v1159_v35 = vpop.eup %1158  ;;  %1178 = vtanh.f32 %v662_v28  ;;  %v916_v2 = vunpack.c.0.s8 %v915_v0 }
 0x1e6   :  { %v1161_v36 = vpop.eup %1160  ;;  %1180 = vtanh.f32 %v578_v32 }
 0x1e7   :  { %v1163_v37 = vpop.eup %1162  ;;  %1182 = vtanh.f32 %v657_v33  ;;  %v1078_v38 = vpack.c.bf16 %v1161_v36, %v1153_v26  ;;  %v919_v11 = vsub.s32 %v916_v2, %v918_v3 }
 0x1e8   :  { %v1165_v39 = vpop.eup %1164  ;;  %v1082_v40 = vpack.c.bf16 %v1163_v37, %v1155_v31 }
 0x1e9   :  { %v1167_v41 = vpop.eup %1166  ;;  %v1076_v42 = vpack.c.bf16 %v1165_v39, %v1157_v34 }
 0x1ea   :  { %v1169_v43 = vpop.eup %1168  ;;  %v1080_v44 = vpack.c.bf16 %v1167_v41, %v1159_v35 }
 0x1eb   :  { %v1171_v45 = vpop.eup %1170  ;;  %1077 = vmatprep.subr.bf16.mxu0 %v1076_v42 }
 0x1ec   :  { %v1173_v46 = vpop.eup %1172  ;;  %1081 = vmatprep.subr.bf16.mxu1 %v1080_v44  ;;  %1079 = vmatpush1.bf16.msra.mxu0 %v1078_v38 }
 0x1ed   :  { %v1175_v48 = vpop.eup %1174  ;;  %1083 = vmatpush1.bf16.msra.mxu1 %v1082_v40  ;;  %1088 = vmatprep.subr.bf16.mxu0 %v1210_v49 }
 0x1ee   :  { %v1177_v50 = vpop.eup %1176  ;;  %v1089_v51 = vpack.c.bf16 %v1171_v45, %v1175_v48 }
 0x1ef   :  { %v1179_v52 = vpop.eup %1178  ;;  %978 = vmatmul.mubr.msk.f32.vlgmr.msra.gmra.mrb[18].mxu0 %vm389_vm1, %v685_v47  ;;  %v1086_v53 = vpack.c.bf16 %v1177_v50, %v1169_v43 }
 0x1f0   :  { %v1181_v54 = vpop.eup %1180  ;;  %1090 = vmatpush3.bf16.msra.mxu0 %v1089_v51  ;;  %1033 = vmatprep.mubr.msk.f32.mxu0 %vm1211_vm2, %v1208_v5 }
 0x1f1   :  { %v1183_v55 = vpop.eup %1182  ;;  %v1084_v56 = vpack.c.bf16 %v1181_v54, %v1173_v46  ;;  %1091 = vmatprep.subr.bf16.mxu0 %v1210_v49 }
 0x1f2   :  { %v1092_v57 = vpack.c.bf16 %v1179_v52, %v1183_v55 }
 0x1f3   :  { %1085 = vmatprep.subr.bf16.mxu1 %v1084_v56 }
 0x1f4   :  { %1087 = vmatpush1.bf16.msra.mxu1 %v1086_v53  ;;  %1093 = vmatpush3.bf16.msra.mxu0 %v1092_v57 }
 0x1f7   :  { %979 = vmatmul.mubr.msk.f32.vlgmr.msra.gmra.mrb[22].mxu1 %vm389_vm1, %v685_v47  ;;  %1034 = vmatmul.mubr.msk.f32.vlgmr.msra.gmra.mrb[20].mxu0 %vm389_vm1, %v685_v47 }
 0x2c2   :  { %v761_v59 = vpop.f32.mrb[18].mxu0 }
 0x2c3   :  { %v762_v60 = vadd.f32 %v761_v59, %v690_v58  ;;  %v763_v61 = vpop.f32.mrb[19].mxu0 }
 0x2c4   :  { %v764_v62 = vadd.f32 %v763_v61, %v690_v58 }
 0x2c6   :  { %v912_v5 = vcombine.low %v762_v60, %v764_v62 }
 0x2c8   :  { %v920_v14 = vrot.slane %v912_v5, %v919_v11 }
 0x2ca   :  { %v832_v4 = vpop.f32.mrb[22].mxu1  ;;  %v903_v6 = vpop.f32.mrb[20].mxu0 }
 0x2cb   :  { %v833_v7 = vadd.f32 %v832_v4, %v690_v58  ;;  %v904_v8 = vadd.f32 %v903_v6, %v690_v58  ;;  %v834_v9 = vpop.f32.mrb[23].mxu1  ;;  %v1035_v10 = vpop.f32.mrb[21].mxu0 }
 0x2cc   :  { %v835_v12 = vadd.f32 %v834_v9, %v690_v58 }
 0x2cd   :  { %981 = vst.sshfl [vmem:[#allocation2 + $0x8] sm:$0x3 pattern:$0x76325410] %v904_v8 }
 0x2ce   :  { %v913_v13 = vcombine.low %v833_v7, %v835_v12 }
 0x2d0   :  { %v927_v15 = vrot.slane %v913_v13, %v919_v11 }
 0x2d2   :  { %v928_v16 = vcombine.low %v920_v14, %v927_v15 }
 0x2d4   :  { %938 = vst [vmem:[#allocation2] sm:$0xff] %v928_v16 }
 0x2d5   :  { %1195 = shalt.err (!%p1192_p4)
}
 0x2d6   :  { %s1196_s8 = scalar_lea.hbm %s1410_s7, 160 }
 0x2d7   :  { %p1197_p5 = scmp.ne.s32.totalorder %s1410_s7, %s1196_s8  ;;  %p1200_p6 = scmp.lt.u32.totalorder %s1196_s8, %s1410_s7 }
 0x2d9   :  { %p1202_p7 = pnand %p1200_p6, %p1197_p5 }
 0x2db   :  { %1205 = shalt.err (!%p1202_p7)
}
 0x2dc   :  { %949 = dma.vmem_to_hbm [thread:$0]  %s947_s28, 160, %s1410_s7, [#allocation3]  }
 0x2dd   :  { %1206 = dma.done.wait [#allocation3], 160  }
 0x2de   :  { %1207 = vsyncadd [#allocation3], 4294967136 }
 0x2df   :  { %953 = vsyncpa [#allocation3], 1 }

</bundles_post_ra>
